<compile_context>
chip_gen: v7x
topology: tpu7x:2x2x1
jax: 0.10.0
libtpu: 0.0.40
codegen_flags: <defaults>
</compile_context>

<pallas_src>
import jax
import jax.numpy as jnp
from jax.experimental import pallas as pl
from jax.experimental.pallas import tpu as pltpu


def _diag_linear_kernel(x_ref, w_ref, o_ref):
    # x_ref: (tm, tf) input tile (native dtype); w_ref: (1, tf) weight row (out dtype).
    # Cast x up to the output dtype BEFORE the multiply so mixed-precision inputs
    # (e.g. bf16 x, f32 weight) keep a full-precision product. Pure VPU broadcast.
    o_ref[...] = x_ref[...].astype(o_ref.dtype) * w_ref[...]


def _round_up(n: int, m: int) -> int:
    return ((n + m - 1) // m) * m


# Below this element count the pallas_call launch + per-step overhead can't beat
# XLA's fused broadcast multiply (already at HBM roofline for a standalone op).
_SMALL_INPUT_ELEMS = 1 << 18

# Target OUTPUT bytes per block. Double-buffered in+out blocks (+ tiny weight)
# stay well under _VMEM_LIMIT_BYTES on v5e/v6e (128 MiB) and v7x (64 MiB).
_TARGET_BLOCK_BYTES = 4 * 1024 * 1024

# Minimum desired lane-row width in bytes before folding rows into the lane axis.
_TARGET_LANE_BYTES = 4 * 1024

# Explicit VMEM budget: above v5e's 16 MiB scoped default, below v7x's 64 MiB physical.
_VMEM_LIMIT_BYTES = 40 * 1024 * 1024


def _pick_row_fold(rows: int, features: int, itemsize: int) -> int:
    """Largest k <= target that divides `rows`, to widen (R, F) -> (R/k, k*F)."""
    lane_bytes = features * itemsize
    if rows < 2 or lane_bytes >= _TARGET_LANE_BYTES:
        return 1
    k_target = min(rows, -(-_TARGET_LANE_BYTES // lane_bytes))
    for k in range(k_target, 1, -1):
        if rows % k == 0:
            return k
    return 1


def diag_linear(x: jax.Array, weight: jax.Array, *, force_pallas: bool = False) -> jax.Array:
    """Pallas implementation of DiagLinear.forward: x * weight (broadcast on last dim)."""
    assert x.ndim >= 1
    features = x.shape[-1]
    assert weight.shape == (features,), (weight.shape, features)

    out_dtype = jnp.result_type(x.dtype, weight.dtype)
    orig_shape = x.shape

    # Tiny-input fast path: plain fused XLA broadcast multiply.
    if x.size <= _SMALL_INPUT_ELEMS and not force_pallas:
        return (x.astype(out_dtype) * weight.astype(out_dtype)).reshape(orig_shape)

    # Keep x in its native dtype (cast happens inside the kernel) so XLA does not
    # materialize a converted copy in HBM before the call.
    x2d = x.reshape(-1, features)
    rows = x2d.shape[0]

    out_itemsize = jnp.dtype(out_dtype).itemsize
    x_itemsize = jnp.dtype(x2d.dtype).itemsize

    # Fold k rows into the lane axis when the feature dim is narrow. The x reshape
    # is free (row-major contiguous); the weight tile is tiny.
    k = _pick_row_fold(rows, features, out_itemsize)
    rows_w = rows // k
    features_w = features * k
    x2d = x2d.reshape(rows_w, features_w)
    w_row = weight.astype(out_dtype)
    if k > 1:
        w_row = jnp.tile(w_row, k)
    w2d = w_row.reshape(1, features_w)

    # Sublane packing multiple based on the narrowest dtype touched
    # (8 rows for 4-byte, 16 for 2-byte, 32 for 1-byte dtypes).
    sub_mult = {4: 8, 2: 16, 1: 32}.get(min(out_itemsize, x_itemsize), 8)

    # Feature (lane) tile: lane-dense multiple of 128 whenever features_w >= 128;
    # partial tail feature blocks are masked by Pallas (no full-extent fallback).
    if features_w < 128:
        tf = features_w  # block must equal the full dim when < 128
    else:
        max_tf = max(128, (_TARGET_BLOCK_BYTES // (sub_mult * out_itemsize)) // 128 * 128)
        tf = min(max_tf, _round_up(features_w, 128))

    # Row (sublane) tile: ~_TARGET_BLOCK_BYTES of output per block, dtype-aligned.
    tm = _TARGET_BLOCK_BYTES // (tf * out_itemsize)
    tm = max(sub_mult, (tm // sub_mult) * sub_mult)
    tm = min(tm, _round_up(rows_w, sub_mult))

    # Grid: feature tiles OUTER, row tiles INNER so the (1, tf) weight block index
    # is constant across the inner axis and Pallas skips re-DMAing it.
    grid = (pl.cdiv(features_w, tf), pl.cdiv(rows_w, tm))

    cost = pl.CostEstimate(
        flops=rows_w * features_w,
        transcendentals=0,
        bytes_accessed=rows_w * features_w * (x_itemsize + out_itemsize)
        + features_w * out_itemsize,
    )

    # TODO(synk): on v7x, sweep pipeline_mode=pl.Buffered(3) on the x BlockSpec if
    # profiles show exposed DMA at these short per-step times.
    out = pl.pallas_call(
        _diag_linear_kernel,
        out_shape=jax.ShapeDtypeStruct((rows_w, features_w), out_dtype),
        grid_spec=pl.GridSpec(
            grid=grid,
            in_specs=[
                pl.BlockSpec((tm, tf), lambda j, i: (i, j)),
                # Weight: resident (1, tf) row, follows only the (outer) feature axis.
                pl.BlockSpec((1, tf), lambda j, i: (0, j)),
            ],
            out_specs=pl.BlockSpec((tm, tf), lambda j, i: (i, j)),
        ),
        compiler_params=pltpu.CompilerParams(
            dimension_semantics=("parallel", "parallel"),
            vmem_limit_bytes=_VMEM_LIMIT_BYTES,
        ),
        cost_estimate=cost,
    )(x2d, w2d)

    return out.reshape(orig_shape)


if __name__ == "__main__":
    key = jax.random.PRNGKey(0)
    k_x, k_w, k_x2, k_x3, k_w3 = jax.random.split(key, 5)

    # Small shapes consistent with the module (batch=2, input_features=128).
    batch, input_features = 2, 128
    x = jax.random.normal(k_x, (batch, input_features), dtype=jnp.float32)
    # weight ~ uniform(-0.1, 0.1), matching the nn.Parameter init in __init__.
    weight = jax.random.uniform(
        k_w, (input_features,), dtype=jnp.float32, minval=-0.1, maxval=0.1
    )

    # Force the Pallas path so the kernel actually executes on this small shape.
    y = diag_linear(x, weight, force_pallas=True)
    jax.block_until_ready(y)
    assert y.shape == x.shape
    assert jnp.allclose(y, x * weight, atol=1e-6, rtol=1e-6)

    # Non-divisible row count (3*7 = 21 rows) + bf16 input exercises the row-fold,
    # partial-block masking, and the in-kernel up-cast (result stays f32).
    x2 = jax.random.normal(k_x2, (3, 7, input_features), dtype=jnp.bfloat16)
    y2 = diag_linear(x2, weight, force_pallas=True)
    jax.block_until_ready(y2)
    ref2 = x2.astype(jnp.float32) * weight
    assert y2.shape == x2.shape
    assert y2.dtype == jnp.float32
    assert jnp.allclose(y2, ref2, atol=1e-6, rtol=1e-6)

    # Non-128-divisible feature dim (F=200) exercises the 128-multiple feature tile
    # with a masked tail instead of a full-extent fallback.
    x3 = jax.random.normal(k_x3, (16, 200), dtype=jnp.float32)
    w3 = jax.random.uniform(k_w3, (200,), dtype=jnp.float32, minval=-0.1, maxval=0.1)
    y3 = diag_linear(x3, w3, force_pallas=True)
    jax.block_until_ready(y3)
    assert y3.shape == x3.shape
    assert jnp.allclose(y3, x3 * w3, atol=1e-6, rtol=1e-6)

    # Tiny-input fast path (plain fused XLA multiply).
    y4 = diag_linear(x, weight)
    jax.block_until_ready(y4)
    assert jnp.allclose(y4, x * weight, atol=1e-6, rtol=1e-6)

    print("KERNEL_OK")
</pallas_src>

<mosaic_0001>
module attributes {stable_mosaic.version = 11 : i64} {
  func.func @_diag_linear_kernel(%arg0: i32, %arg1: i32, %arg2: memref<8x256xf32, #tpu.memory_space<vmem>>, %arg3: memref<1x256xf32, #tpu.memory_space<vmem>>, %arg4: memref<8x256xf32, #tpu.memory_space<vmem>>) attributes {dimension_semantics = [#tpu.dimension_semantics<parallel>, #tpu.dimension_semantics<parallel>], iteration_bounds = array<i64: 1, 1>, scalar_prefetch = 0 : i64, scratch_operands = 0 : i64, tpu.core_type = #tpu.core_type<tc>, window_params = [{transform_indices = @transform_0, window_bounds = array<i64: 8, 256>}, {transform_indices = @transform_1, window_bounds = array<i64: 1, 256>}, {transform_indices = @transform_2, window_bounds = array<i64: 8, 256>}]} {
    %c0 = arith.constant 0 : index
    %c0_0 = arith.constant 0 : index
    %0 = vector.load %arg2[%c0, %c0_0] : memref<8x256xf32, #tpu.memory_space<vmem>>, vector<8x256xf32>
    %c0_1 = arith.constant 0 : index
    %c0_2 = arith.constant 0 : index
    %1 = vector.load %arg3[%c0_1, %c0_2] : memref<1x256xf32, #tpu.memory_space<vmem>>, vector<1x256xf32>
    %2 = vector.broadcast %1 : vector<1x256xf32> to vector<8x256xf32>
    %3 = arith.mulf %0, %2 : vector<8x256xf32>
    %c0_3 = arith.constant 0 : index
    %c0_4 = arith.constant 0 : index
    %4 = vector.load %arg4[%c0_3, %c0_4] : memref<8x256xf32, #tpu.memory_space<vmem>>, vector<8x256xf32>
    tpu.vector_store %arg4[%c0_3, %c0_4], %3 {strides = array<i32>} : memref<8x256xf32, #tpu.memory_space<vmem>>, vector<8x256xf32>,
    return
  }
  func.func @transform_0(%arg0: i32, %arg1: i32) -> (i32, i32) {
    %c0_i32 = arith.constant 0 : i32
    return %arg1, %arg0 : i32, i32
  }
  func.func @transform_1(%arg0: i32, %arg1: i32) -> (i32, i32) {
    %c0_i32 = arith.constant 0 : i32
    %c0_i32_0 = arith.constant 0 : i32
    return %c0_i32, %arg0 : i32, i32
  }
  func.func @transform_2(%arg0: i32, %arg1: i32) -> (i32, i32) {
    %c0_i32 = arith.constant 0 : i32
    return %arg1, %arg0 : i32, i32
  }
}

</mosaic_0001>

<bundles_post_ra>
// kernel: tpu_custom_call.1
= control target key start
LH: loop header
LB: loop body
LE: loop exit
PB: predicated region body
PF: predicated region fallthrough
CT: control target
= control target key end

     0   :  { %7 = vsyncpa [#allocation3], 0  ;;  %s265_s0 = inlined_call_operand.hbm [shape: f32[1,256], index: 0, kind: input, shape index: {}]   ;;  %s266_s1 = inlined_call_operand.vmem [shape: f32[1,256], index: 1, kind: input, shape index: {}]   ;;  %s267_s2 = inlined_call_operand.hbm [shape: f32[1,256], index: 2, kind: output, shape index: {}]  }
   0x1   :  { %8 = vsyncpa [#allocation4], 0 }
   0x2   :  { %13 = vsyncadd [#allocation3], 224  ;;  %s192_s9 = smov [#allocation2]   ;;  %s144_s13 = scalar_lea.hbm %s265_s0, 32 }
   0x3   :  { %s14_s10 = sshll.u32 %s192_s9, 4  ;;  %p145_p0 = scmp.ne.s32.totalorder %s265_s0, %s144_s13  ;;  %s15_s10 = int_to_ptr.vmem [resolvable:$true] %s14_s10 }
   0x4   :  { %p148_p1 = scmp.lt.u32.totalorder %s144_s13, %s265_s0 }
   0x6   :  { %p150_p2 = pnand %p148_p1, %p145_p0 }
   0x8   :  { %153 = shalt.err (!%p150_p2)
}
   0x9   :  { %s154_s18 = scalar_lea.vmem %s15_s10, 32  ;;  %s158_s19 = scalar_lea.vmem %s15_s10, 256 }
   0xa   :  { %p155_p3 = scmp.ne.s32.totalorder %s15_s10, %s154_s18  ;;  %p159_p4 = scmp.lt.s32.totalorder %s15_s10, %s15_s10 }
   0xb   :  { %p160_p5 = scmp.lt.s32.totalorder %s158_s19, %s154_s18 }
   0xd   :  { %p161_p6 = por %p160_p5, %p159_p4 }
   0xf   :  { %p162_p7 = pnand %p161_p6, %p155_p3 }
  0x11   :  { %165 = shalt.err (!%p162_p7)
}
  0x12   :  { %s193_s20 = smov 32   ;;  %s194_s21 = smov 2  }
  0x13   :  { %20 = dma.hbm_to_vmem [thread:$0]  %s265_s0, 32, %s15_s10, [#allocation3], %s193_s20, %s193_s20, %s194_s21  }
  0x14   :  { %188 = dma.done.wait [#allocation3], 256  }
  0x15   :  { %189 = vsyncadd [#allocation3], 4294967040  ;;  %v36_v0 = vlaneseq  ;;  %v195_v1 = vmov 1966171168   ;;  %v34_v7 = vld [vmem:[%s266_s1] sm:$0x3] }
  0x16   :  { %v47_v2 = vunpack.c.l.s4 %v195_v1  ;;  %v26_v15 = vld [vmem:[#allocation2] sm:$0x3]  ;;  %v30_v16 = vld [vmem:[#allocation2 + $0x8] sm:$0x3]  ;;  %v27_v22 = vld [vmem:[#allocation2 + $0x2] sm:$0x3] }
  0x17   :  { %v37_v3 = vshrl.u32 %v36_v0, 7  ;;  %vm230_vm0 = vcmp.lt.s32.totalorder %v36_v0, 256  ;;  %v28_v23 = vld [vmem:[#allocation2 + $0x4] sm:$0x3]  ;;  %v31_v28 = vld [vmem:[#allocation2 + $0xa] sm:$0x3] }
  0x18   :  { %v48_v6 = vunpack.c.0.s8 %v47_v2  ;;  %v32_v29 = vld [vmem:[#allocation2 + $0xc] sm:$0x3]  ;;  %v29_v30 = vld [vmem:[#allocation2 + $0x6] sm:$0x3]  ;;  %v33_v36 = vld [vmem:[#allocation2 + $0xe] sm:$0x3] }
  0x19   :  { %v38_v4 = vsub.s32 0, %v37_v3  ;;  %v42_v5 = vsub.s32 1, %v37_v3 }
  0x1a   :  { %v51_v10 = vsub.s32 %v48_v6, %v37_v3 }
  0x1b   :  { %v39_v8 = vrot.slane %v34_v7, %v38_v4  ;;  %v43_v9 = vrot.slane %v34_v7, %v42_v5 }
  0x1d   :  { %v44_v11 = vcombine.low %v39_v8, %v43_v9  ;;  %v45_v12 = vcombine.high %v39_v8, %v43_v9 }
  0x1f   :  { %v52_v13 = vrot.slane %v44_v11, %v51_v10  ;;  %v59_v14 = vrot.slane %v45_v12, %v51_v10 }
  0x21   :  { %v68_v17 = vrot.slane %v52_v13, %v51_v10  ;;  %v60_v18 = vcombine.high %v52_v13, %v52_v13  ;;  %v75_v19 = vrot.slane %v59_v14, %v51_v10  ;;  %v61_v20 = vcombine.high %v59_v14, %v59_v14 }
  0x23   :  { %v102_v24 = vmul.f32 %v68_v17, %v26_v15  ;;  %v82_v25 = vrot.slane %v60_v18, %v51_v10  ;;  %v90_v26 = vcombine.high %v68_v17, %v68_v17  ;;  %v106_v27 = vmul.f32 %v75_v19, %v30_v16 }
  0x24   :  { %v89_v31 = vrot.slane %v61_v20, %v51_v10  ;;  %v91_v32 = vcombine.high %v75_v19, %v75_v19 }
  0x25   :  { %114 = vst.msk [vmem:[#allocation5] sm:$0x3] %vm230_vm0, %v102_v24  ;;  %v103_v33 = vmul.f32 %v82_v25, %v27_v22  ;;  %v104_v34 = vmul.f32 %v90_v26, %v28_v23  ;;  %v92_v35 = vcombine.high %v82_v25, %v82_v25  ;;  %118 = vst.msk [vmem:[#allocation5 + $0x8] sm:$0x3] %vm230_vm0, %v106_v27 }
  0x26   :  { %v107_v37 = vmul.f32 %v89_v31, %v31_v28  ;;  %v108_v38 = vmul.f32 %v91_v32, %v32_v29  ;;  %v93_v39 = vcombine.high %v89_v31, %v89_v31 }
  0x27   :  { %115 = vst.msk [vmem:[#allocation5 + $0x2] sm:$0x3] %vm230_vm0, %v103_v33  ;;  %116 = vst.msk [vmem:[#allocation5 + $0x4] sm:$0x3] %vm230_vm0, %v104_v34  ;;  %v105_v40 = vmul.f32 %v92_v35, %v29_v30 }
  0x28   :  { %119 = vst.msk [vmem:[#allocation5 + $0xa] sm:$0x3] %vm230_vm0, %v107_v37  ;;  %120 = vst.msk [vmem:[#allocation5 + $0xc] sm:$0x3] %vm230_vm0, %v108_v38  ;;  %v109_v41 = vmul.f32 %v93_v39, %v33_v36 }
  0x29   :  { %117 = vst.msk [vmem:[#allocation5 + $0x6] sm:$0x3] %vm230_vm0, %v105_v40 }
  0x2a   :  { %121 = vst.msk [vmem:[#allocation5 + $0xe] sm:$0x3] %vm230_vm0, %v109_v41 }
  0x2b   :  { %126 = vsyncadd [#allocation4], 224  ;;  %s196_s0 = smov [#allocation5]  }
  0x2c   :  { %s127_s1 = sshll.u32 %s196_s0, 4  ;;  %s128_s1 = int_to_ptr.vmem [resolvable:$true] %s127_s1 }
  0x2d   :  { %s166_s26 = scalar_lea.vmem %s128_s1, 32  ;;  %s170_s27 = scalar_lea.vmem %s128_s1, 256 }
  0x2e   :  { %p167_p8 = scmp.ne.s32.totalorder %s128_s1, %s166_s26  ;;  %p171_p9 = scmp.lt.s32.totalorder %s128_s1, %s128_s1 }
  0x2f   :  { %p172_p10 = scmp.lt.s32.totalorder %s170_s27, %s166_s26 }
  0x31   :  { %p173_p11 = por %p172_p10, %p171_p9 }
  0x33   :  { %p174_p12 = pnand %p173_p11, %p167_p8 }
  0x35   :  { %177 = shalt.err (!%p174_p12)
}
  0x36   :  { %s178_s30 = scalar_lea.hbm %s267_s2, 32 }
  0x37   :  { %p179_p13 = scmp.ne.s32.totalorder %s267_s2, %s178_s30  ;;  %p182_p0 = scmp.lt.u32.totalorder %s178_s30, %s267_s2 }
  0x39   :  { %p184_p1 = pnand %p182_p0, %p179_p13 }
  0x3b   :  { %187 = shalt.err (!%p184_p1)
}
  0x3c   :  { %133 = dma.vmem_to_hbm [thread:$0]  %s128_s1, 32, %s267_s2, [#allocation4], %s193_s20, %s193_s20, %s194_s21  }
  0x3d   :  { %190 = dma.done.wait [#allocation4], 256  }
  0x3e   :  { %191 = vsyncadd [#allocation4], 4294967040 }
  0x3f   :  { %137 = vsyncpa [#allocation3], 1 }
  0x40   :  { %138 = vsyncpa [#allocation4], 1 }

</bundles_post_ra>
